<compile_context>
chip_gen: v6e
topology: v6e:2x2x1
jax: 0.10.0
libtpu: 0.0.40
codegen_flags: <defaults>
</compile_context>

<pallas_src>
import jax
import jax.numpy as jnp
from jax.experimental import pallas as pl
from jax.experimental.pallas import tpu as pltpu

GAMMA = 1.5
ALPHA = 0.25
LANES = 128
SUBLANES = 8
PAD_LOGIT = -1.0e4  # with true=0 this yields exactly zero loss contribution


def _round_up(x, m):
    return ((x + m - 1) // m) * m


def _focal_loss_kernel(pred_ref, true_ref, out_ref, acc_ref):
    i = pl.program_id(1)

    @pl.when(i == 0)
    def _():
        acc_ref[...] = jnp.zeros_like(acc_ref)

    x = pred_ref[...].astype(jnp.float32)
    y = true_ref[...].astype(jnp.float32)

    # Shared exp(-|x|) serves both the numerically stable BCE-with-logits log
    # term and the sigmoid (EUP traffic: 1 exp + 1 log + 1 divide / element).
    ax = jnp.abs(x)
    e = jnp.exp(-ax)
    log_term = jnp.log(1.0 + e)          # e in (0, 1] -> plain log is accurate
    # BCEWithLogitsLoss(reduction='none'): max(x,0) - x*y + log(1 + exp(-|x|))
    bce = jnp.maximum(x, 0.0) - x * y + log_term

    inv = 1.0 / (1.0 + e)                          # sigmoid(|x|)
    pred_prob = jnp.where(x >= 0.0, inv, e * inv)  # sigmoid(x)

    p_t = y * pred_prob + (1.0 - y) * (1.0 - pred_prob)
    alpha_factor = y * ALPHA + (1.0 - y) * (1.0 - ALPHA)
    one_minus_pt = 1.0 - p_t
    if GAMMA == 1.5:
        # (1 - p_t)**1.5 == z * sqrt(z), z >= 0 (avoids generic pow)
        modulating_factor = one_minus_pt * jnp.sqrt(one_minus_pt)
    else:
        modulating_factor = one_minus_pt ** GAMMA

    loss = bce * alpha_factor * modulating_factor

    # Fold the tile into a vreg-shaped accumulator (pure VPU adds per step);
    # the cross-lane reduction is deferred to the wrapper epilogue.
    acc_ref[...] += loss.reshape(-1, SUBLANES, LANES).sum(axis=0)

    @pl.when(i == pl.num_programs(1) - 1)
    def _():
        out_ref[0] = acc_ref[...]


def focal_loss(pred, true, *, max_tile_rows=2048, num_splits=2):
    """Focal loss (gamma=1.5, alpha=0.25) over BCE-with-logits, mean reduction."""
    assert pred.shape == true.shape
    assert max_tile_rows % SUBLANES == 0
    numel = pred.size
    assert numel > 0

    rows = pl.cdiv(numel, LANES)
    rows_per_split = pl.cdiv(rows, num_splits)
    tile_rows = min(max_tile_rows, _round_up(rows_per_split, SUBLANES))
    padded_rows = _round_up(rows, num_splits * tile_rows)
    grid_inner = padded_rows // (num_splits * tile_rows)
    padded_numel = padded_rows * LANES
    pad = padded_numel - numel

    pred_flat = pred.reshape(-1)
    true_flat = true.reshape(-1)
    if pad:
        pred_flat = jnp.concatenate(
            [pred_flat, jnp.full((pad,), PAD_LOGIT, dtype=pred_flat.dtype)])
        true_flat = jnp.concatenate(
            [true_flat, jnp.zeros((pad,), dtype=true_flat.dtype)])
    pred2 = pred_flat.reshape(padded_rows, LANES)
    true2 = true_flat.reshape(padded_rows, LANES)

    def in_map(c, i):
        return (c * grid_inner + i, 0)

    partials = pl.pallas_call(
        _focal_loss_kernel,
        out_shape=jax.ShapeDtypeStruct((num_splits, SUBLANES, LANES),
                                       jnp.float32),
        grid_spec=pltpu.PrefetchScalarGridSpec(
            num_scalar_prefetch=0,
            grid=(num_splits, grid_inner),
            in_specs=[
                pl.BlockSpec((tile_rows, LANES), in_map),
                pl.BlockSpec((tile_rows, LANES), in_map),
            ],
            out_specs=pl.BlockSpec((1, SUBLANES, LANES),
                                   lambda c, i: (c, 0, 0)),
            scratch_shapes=[pltpu.VMEM((SUBLANES, LANES), jnp.float32)],
        ),
        compiler_params=pltpu.CompilerParams(
            dimension_semantics=("parallel", "arbitrary"),
        ),
    )(pred2, true2)

    # reduction == 'mean' (padding contributes exactly zero to the sum).
    return jnp.sum(partials) / numel


def _focal_loss_ref(pred, true):
    x = pred.astype(jnp.float32)
    y = true.astype(jnp.float32)
    bce = jnp.maximum(x, 0.0) - x * y + jnp.log1p(jnp.exp(-jnp.abs(x)))
    p = jax.nn.sigmoid(x)
    p_t = y * p + (1 - y) * (1 - p)
    alpha_factor = y * ALPHA + (1 - y) * (1 - ALPHA)
    mod = (1.0 - p_t) ** GAMMA
    return jnp.mean(bce * alpha_factor * mod)


if __name__ == "__main__":
    key = jax.random.PRNGKey(0)
    k1, k2, k3, k4 = jax.random.split(key, 4)

    # pred: raw logits, true: binary targets — NCHW-like detection head output.
    B, C, H, W = 2, 4, 16, 16
    pred = jax.random.normal(k1, (B, C, H, W), dtype=jnp.float32) * 2.0
    true = (jax.random.uniform(k2, (B, C, H, W)) > 0.5).astype(jnp.float32)

    out = jax.block_until_ready(focal_loss(pred, true))
    ref = _focal_loss_ref(pred, true)
    assert jnp.allclose(out, ref, rtol=1e-5, atol=1e-6), (out, ref)

    # Ragged shape (exercises the zero-contribution padding path).
    pred_r = jax.random.normal(k3, (2, 3, 7, 5), dtype=jnp.float32) * 2.0
    true_r = (jax.random.uniform(k4, (2, 3, 7, 5)) > 0.5).astype(jnp.float32)
    out_r = jax.block_until_ready(focal_loss(pred_r, true_r))
    ref_r = _focal_loss_ref(pred_r, true_r)
    assert jnp.allclose(out_r, ref_r, rtol=1e-5, atol=1e-6), (out_r, ref_r)

    print("KERNEL_OK")
</pallas_src>

<mosaic_0001>
module attributes {stable_mosaic.version = 11 : i64} {
  func.func @_focal_loss_kernel(%arg0: i32, %arg1: i32, %arg2: memref<8x128xf32, #tpu.memory_space<vmem>>, %arg3: memref<8x128xf32, #tpu.memory_space<vmem>>, %arg4: memref<1x8x128xf32, #tpu.memory_space<vmem>>, %arg5: memref<8x128xf32, #tpu.memory_space<vmem>>) attributes {dimension_semantics = [#tpu.dimension_semantics<parallel>, #tpu.dimension_semantics<arbitrary>], iteration_bounds = array<i64: 2, 1>, scalar_prefetch = 0 : i64, scratch_operands = 1 : i64, tpu.core_type = #tpu.core_type<tc>, window_params = [{transform_indices = @transform_0, window_bounds = array<i64: 8, 128>}, {transform_indices = @transform_1, window_bounds = array<i64: 8, 128>}, {transform_indices = @transform_2, window_bounds = array<i64: 1, 8, 128>}]} {
    %c0_i32 = arith.constant 0 : i32
    %0 = arith.cmpi eq, %arg1, %c0_i32 : i32
    %1 = arith.extui %0 : i1 to i32
    %c0_i32_0 = arith.constant 0 : i32
    %2 = arith.cmpi ne, %1, %c0_i32_0 : i32
    scf.if %2 {
      %cst_22 = arith.constant 0.000000e+00 : f32
      %53 = vector.broadcast %cst_22 : f32 to vector<8x128xf32>
      %c0_23 = arith.constant 0 : index
      %c0_24 = arith.constant 0 : index
      %54 = vector.load %arg5[%c0_23, %c0_24] : memref<8x128xf32, #tpu.memory_space<vmem>>, vector<8x128xf32>
      tpu.vector_store %arg5[%c0_23, %c0_24], %53 {strides = array<i32>} : memref<8x128xf32, #tpu.memory_space<vmem>>, vector<8x128xf32>,
    } else {
    }
    %c0 = arith.constant 0 : index
    %c0_1 = arith.constant 0 : index
    %3 = vector.load %arg2[%c0, %c0_1] : memref<8x128xf32, #tpu.memory_space<vmem>>, vector<8x128xf32>
    %c0_2 = arith.constant 0 : index
    %c0_3 = arith.constant 0 : index
    %4 = vector.load %arg3[%c0_2, %c0_3] : memref<8x128xf32, #tpu.memory_space<vmem>>, vector<8x128xf32>
    %5 = math.absf %3 : vector<8x128xf32>
    %cst = arith.constant 0.000000e+00 : f32
    %6 = vector.broadcast %cst : f32 to vector<8x128xf32>
    %7 = arith.subf %6, %5 : vector<8x128xf32>
    %8 = math.exp %7 : vector<8x128xf32>
    %cst_4 = arith.constant 1.000000e+00 : f32
    %9 = vector.broadcast %cst_4 : f32 to vector<8x128xf32>
    %10 = arith.addf %9, %8 : vector<8x128xf32>
    %11 = math.log %10 : vector<8x128xf32>
    %cst_5 = arith.constant 0.000000e+00 : f32
    %12 = vector.broadcast %cst_5 : f32 to vector<8x128xf32>
    %13 = arith.maximumf %3, %12 : vector<8x128xf32>
    %14 = arith.mulf %3, %4 : vector<8x128xf32>
    %15 = arith.subf %13, %14 : vector<8x128xf32>
    %16 = arith.addf %15, %11 : vector<8x128xf32>
    %cst_6 = arith.constant 1.000000e+00 : f32
    %17 = vector.broadcast %cst_6 : f32 to vector<8x128xf32>
    %18 = arith.addf %17, %8 : vector<8x128xf32>
    %cst_7 = arith.constant 1.000000e+00 : f32
    %19 = vector.broadcast %cst_7 : f32 to vector<8x128xf32>
    %20 = arith.divf %19, %18 : vector<8x128xf32>
    %cst_8 = arith.constant 0.000000e+00 : f32
    %21 = vector.broadcast %cst_8 : f32 to vector<8x128xf32>
    %22 = arith.cmpf oge, %3, %21 : vector<8x128xf32>
    %23 = arith.mulf %8, %20 : vector<8x128xf32>
    %24 = arith.select %22, %20, %23 : vector<8x128xi1>, vector<8x128xf32>
    %25 = arith.mulf %4, %24 : vector<8x128xf32>
    %cst_9 = arith.constant 1.000000e+00 : f32
    %26 = vector.broadcast %cst_9 : f32 to vector<8x128xf32>
    %27 = arith.subf %26, %4 : vector<8x128xf32>
    %cst_10 = arith.constant 1.000000e+00 : f32
    %28 = vector.broadcast %cst_10 : f32 to vector<8x128xf32>
    %29 = arith.subf %28, %24 : vector<8x128xf32>
    %30 = arith.mulf %27, %29 : vector<8x128xf32>
    %31 = arith.addf %25, %30 : vector<8x128xf32>
    %cst_11 = arith.constant 2.500000e-01 : f32
    %32 = vector.broadcast %cst_11 : f32 to vector<8x128xf32>
    %33 = arith.mulf %4, %32 : vector<8x128xf32>
    %cst_12 = arith.constant 1.000000e+00 : f32
    %34 = vector.broadcast %cst_12 : f32 to vector<8x128xf32>
    %35 = arith.subf %34, %4 : vector<8x128xf32>
    %cst_13 = arith.constant 7.500000e-01 : f32
    %36 = vector.broadcast %cst_13 : f32 to vector<8x128xf32>
    %37 = arith.mulf %35, %36 : vector<8x128xf32>
    %38 = arith.addf %33, %37 : vector<8x128xf32>
    %cst_14 = arith.constant 1.000000e+00 : f32
    %39 = vector.broadcast %cst_14 : f32 to vector<8x128xf32>
    %40 = arith.subf %39, %31 : vector<8x128xf32>
    %41 = math.sqrt %40 : vector<8x128xf32>
    %42 = arith.mulf %40, %41 : vector<8x128xf32>
    %43 = arith.mulf %16, %38 : vector<8x128xf32>
    %44 = arith.mulf %43, %42 : vector<8x128xf32>
    %c0_15 = arith.constant 0 : index
    %c0_16 = arith.constant 0 : index
    %45 = vector.load %arg5[%c0_15, %c0_16] : memref<8x128xf32, #tpu.memory_space<vmem>>, vector<8x128xf32>
    %46 = vector.shape_cast %44 : vector<8x128xf32> to vector<1x8x128xf32>
    %cst_17 = arith.constant dense<0.000000e+00> : vector<8x128xf32>
    %47 = vector.multi_reduction <add>, %46, %cst_17 [0] : vector<1x8x128xf32> to vector<8x128xf32>
    %48 = arith.addf %45, %47 : vector<8x128xf32>
    %c0_18 = arith.constant 0 : index
    %c0_19 = arith.constant 0 : index
    %49 = vector.load %arg5[%c0_18, %c0_19] : memref<8x128xf32, #tpu.memory_space<vmem>>, vector<8x128xf32>
    tpu.vector_store %arg5[%c0_18, %c0_19], %48 {strides = array<i32>} : memref<8x128xf32, #tpu.memory_space<vmem>>, vector<8x128xf32>,
    %c0_i32_20 = arith.constant 0 : i32
    %50 = arith.cmpi eq, %arg1, %c0_i32_20 : i32
    %51 = arith.extui %50 : i1 to i32
    %c0_i32_21 = arith.constant 0 : i32
    %52 = arith.cmpi ne, %51, %c0_i32_21 : i32
    scf.if %52 {
      %c0_22 = arith.constant 0 : index
      %c0_23 = arith.constant 0 : index
      %53 = vector.load %arg5[%c0_22, %c0_23] : memref<8x128xf32, #tpu.memory_space<vmem>>, vector<8x128xf32>
      %c0_24 = arith.constant 0 : index
      %c0_25 = arith.constant 0 : index
      %c0_26 = arith.constant 0 : index
      %54 = vector.load %arg4[%c0_24, %c0_25, %c0_26] : memref<1x8x128xf32, #tpu.memory_space<vmem>>, vector<1x8x128xf32>
      %55 = vector.shape_cast %54 : vector<1x8x128xf32> to vector<8x128xf32>
      %56 = vector.shape_cast %53 : vector<8x128xf32> to vector<1x8x128xf32>
      tpu.vector_store %arg4[%c0_24, %c0_25, %c0_26], %56 {strides = array<i32>} : memref<1x8x128xf32, #tpu.memory_space<vmem>>, vector<1x8x128xf32>,
    } else {
    }
    return
  }
  func.func @transform_0(%arg0: i32, %arg1: i32) -> (i32, i32) {
    %c1_i32 = arith.constant 1 : i32
    %0 = arith.muli %arg0, %c1_i32 : i32
    %1 = arith.addi %0, %arg1 : i32
    %c0_i32 = arith.constant 0 : i32
    %c0_i32_0 = arith.constant 0 : i32
    return %1, %c0_i32 : i32, i32
  }
  func.func @transform_1(%arg0: i32, %arg1: i32) -> (i32, i32) {
    %c1_i32 = arith.constant 1 : i32
    %0 = arith.muli %arg0, %c1_i32 : i32
    %1 = arith.addi %0, %arg1 : i32
    %c0_i32 = arith.constant 0 : i32
    %c0_i32_0 = arith.constant 0 : i32
    return %1, %c0_i32 : i32, i32
  }
  func.func @transform_2(%arg0: i32, %arg1: i32) -> (i32, i32, i32) {
    %c0_i32 = arith.constant 0 : i32
    %c0_i32_0 = arith.constant 0 : i32
    %c0_i32_1 = arith.constant 0 : i32
    return %arg0, %c0_i32, %c0_i32_0 : i32, i32, i32
  }
}

</mosaic_0001>

<bundles_post_ra>
// kernel: tpu_custom_call.1
= control target key start
LH: loop header
LB: loop body
LE: loop exit
PB: predicated region body
PF: predicated region fallthrough
CT: control target
= control target key end

     0   :  { %7 = vsyncpa [#allocation4], 0  ;;  %s801_s0 = inlined_call_operand.hbm [shape: f32[16,128], index: 0, kind: input, shape index: {}]   ;;  %s802_s1 = inlined_call_operand.hbm [shape: f32[16,128], index: 1, kind: input, shape index: {}]   ;;  %s803_s2 = inlined_call_operand.hbm [shape: f32[2,8,128], index: 2, kind: output, shape index: {}]  }
   0x1   :  { %9 = vsyncpa [#allocation4 + $0x1], 0 }
   0x2   :  { %10 = vsyncpa [#allocation7], 0 }
   0x3   :  { %12 = vsyncpa [#allocation7 + $0x1], 0 }
   0x4   :  { %13 = vsyncpa [#allocation5], 0 }
   0x5   :  { %15 = vsyncpa [#allocation5 + $0x1], 0  ;;  %s635_s9 = smov 0   ;;  %s637_s10 = smov 0  }
   0x6   :  { %s639_s11 = smov 0   ;;  %s641_s12 = smov 0  }
   0x7   :  { %s643_s13 = smov 0   ;;  %s645_s14 = smov 0  }
   0x8 LB: > { %s384_s15 = sadd.s32 4294967295, %s615_s14   ;;  %s385_s16 = sadd.s32 4294967294, %s615_s14   ;;  %s615_s14 = sphi %s645_s14, %s21_s14   ;;  %s611_s13 = sphi %s643_s13, %s815_s13   ;;  %s607_s12 = sphi %s641_s12, %s814_s12   ;;  %s603_s11 = sphi %s639_s11, %s813_s11   ;;  %s599_s10 = sphi %s637_s10, %s812_s10   ;;  %s595_s9 = sphi %s635_s9, %s811_s9  }
   0x9   : > { %s33_s17 = sadd.s32 1, %s611_s13  ;;  %s42_s18 = sadd.s32 1, %s603_s11 }
   0xa   : > { %p35_p0 = scmp.ge.s32.totalorder %s33_s17, 2  ;;  %p49_p1 = scmp.ne.s32.totalorder %s603_s11, %s599_s10 }
   0xb   : > { %p50_p2 = scmp.eq.s32.totalorder %s615_s14, 0  ;;  %p55_p3 = scmp.ne.s32.totalorder %s599_s10, %s595_s9 }
   0xc   : > { %s817_s17 = smov (%p35_p0, %s33_s17), 0  ;;  %p56_p5 = scmp.eq.s32.totalorder %s384_s15, 0 }
   0xd   : > { %p676_p4 = por %p50_p2, %p49_p1  ;;  %s39_s20 = ssub.s32 %s611_s13, %s817_s17 }
   0xe   : > { %p107_p6 = scmp.eq.s32.totalorder %s384_s15, 1  ;;  %p40_p7 = scmp.eq.s32.totalorder %s39_s20, 0 }
   0xf   : > { %p682_p8 = por %p56_p5, %p55_p3  ;;  %p113_p10 = scmp.eq.s32.totalorder %s385_s16, 1 }
  0x10   : > { %p686_p9 = por %p107_p6, %p49_p1  ;;  %p417_p13 = scmp.lt.s32.totalorder %s615_s14, 2 }
  0x11   : > { %s691_s23 = scalar_select %p40_p7, %s603_s11, %s42_s18  }
  0x12   : > { %p693_p11 = por %p113_p10, %p55_p3  ;;  %s700_s25 = sand.u32 1, %s603_s11  }
  0x13   : > { %s388_s26 = sshll.u32 %s700_s25, 3  ;;  %s389_s27 = sshll.u32 %s611_s13, 7 }
  0x14   : > { %s143_s30 = scalar_lea.hbm %s801_s0, %s389_s27  ;;  %s137_s3 = scalar_lea.vmem [#allocation3], %s388_s26 }
  0x15   : > { %s145_s4 = sshll.u32 %s137_s3, 4  ;;  %p709_p0 = pnand %p417_p13, %p676_p4  ;;  %s146_s4 = int_to_ptr.vmem [resolvable:$true] %s145_s4 }
  0x16   : > { %p392_p1 = scmp.ge.s32.totalorder %s615_s14, 1  ;;  %p169_p2 = scmp.lt.s32.totalorder %s615_s14, 3 }
  0x17   : > { %s134_s6 = scalar_lea.sflag [#allocation4], %s700_s25  ;;  %p477_p3 = pneg %p709_p0 }
  0x18   : > { %s488_s7 = scalar_lea.vmem %s146_s4, 128  ;;  %s617_s8 = smov [#allocation3]  }
  0x19   : > { %p489_p5 = scmp.ne.s32.totalorder %s146_s4, %s488_s7  ;;  %s493_s15 = sshll.u32 %s617_s8, 4  ;;  %s494_s15 = int_to_ptr.vmem [resolvable:$false] %s493_s15 }
  0x1a   : > { %s495_s16 = scalar_lea.vmem %s494_s15, 256  ;;  %p496_p4 = scmp.lt.s32.totalorder %s146_s4, %s494_s15 }
  0x1b   : > { %p491_p6 = pnand %p489_p5, %p477_p3  ;;  %p497_p10 = scmp.lt.s32.totalorder %s495_s16, %s488_s7 }
  0x1d   : > { %p492_p7 = pneg %p491_p6  ;;  %p498_p13 = por %p497_p10, %p496_p4 }
  0x1f   : > { %p499_p12 = pnand %p498_p13, %p492_p7 }
  0x21   : > { %502 = shalt.err (!%p499_p12)
}
  0x22   : > { %409 = dma.hbm_to_vmem [thread:$0]  (!%p709_p0), %s143_s30, 128, %s146_s4, %s134_s6  }
  0x23   : > { %p727_p5 = pnand %p392_p1, %p169_p2  ;;  %s162_s28 = scalar_lea.hbm %s802_s1, %s389_s27 }
  0x24   : > { %s156_s29 = scalar_lea.vmem [#allocation6], %s388_s26  ;;  %s153_s7 = scalar_lea.sflag [#allocation7], %s700_s25 }
  0x25   : > { %s164_s3 = sshll.u32 %s156_s29, 4  ;;  %s618_s30 = smov [#allocation6]   ;;  %s165_s3 = int_to_ptr.vmem [resolvable:$true] %s164_s3 }
  0x26   : > { %s516_s8 = scalar_lea.vmem %s165_s3, 128  ;;  %s521_s4 = sshll.u32 %s618_s30, 4  ;;  %s522_s4 = int_to_ptr.vmem [resolvable:$false] %s521_s4 }
  0x27   : > { %p517_p12 = scmp.ne.s32.totalorder %s165_s3, %s516_s8  ;;  %s523_s6 = scalar_lea.vmem %s522_s4, 256 }
  0x28   : > { %p524_p1 = scmp.lt.s32.totalorder %s165_s3, %s522_s4  ;;  %p525_p2 = scmp.lt.s32.totalorder %s523_s6, %s516_s8 }
  0x29   : > { %p519_p6 = pnand %p517_p12, %p477_p3 }
  0x2a   : > { %p526_p4 = por %p525_p2, %p524_p1 }
  0x2b   : > { %p520_p7 = pneg %p519_p6 }
  0x2d   : > { %p527_p10 = pnand %p526_p4, %p520_p7 }
  0x2f   : > { %530 = shalt.err (!%p527_p10)
}
  0x30   : > { %412 = dma.hbm_to_vmem [thread:$0]  (!%p709_p0), %s162_s28, 128, %s165_s3, %s153_s7  }
  0x31   : > { %173 = sbr.rel (%p727_p5) target bundleno = 140 (0x8c), region = 28  ;;  %s743_s25 = sand.u32 (!%p727_p5), 1, %s599_s10  }
  0x32   : > { %s746_s26 = sshll.u32 (!%p727_p5), %s743_s25, 3  ;;  %s176_s27 = scalar_lea.sflag (!%p727_p5), [#allocation4], %s743_s25 }
  0x33   : > { %s179_s15 = scalar_lea.vmem (!%p727_p5), [#allocation3], %s746_s26 }
  0x36   : > { %582 = dma.done.wait (%p682_p8), %s176_s27, 128  }
  0x37   : > { %584 = vsyncadd (%p682_p8), %s176_s27, 4294967168  ;;  %s185_s5 = scalar_lea.sflag [#allocation7], %s743_s25  ;;  %s188_s16 = scalar_lea.vmem [#allocation6], %s746_s26 }
  0x38   : > { %586 = dma.done.wait (%p682_p8), %s185_s5, 128  }
  0x39   : > { %588 = vsyncadd (%p682_p8), %s185_s5, 4294967168  ;;  %v221_v0 = vld [vmem:[%s179_s15] sm:$0xff]  ;;  %v222_v6 = vld [vmem:[%s188_s16] sm:$0xff]  ;;  %s213_s21 = scalar_lea.vmem [#allocation8], %s746_s26  ;;  %s397_s19 = sshll.u32 %s607_s12, 7 }
  0x3a   : > { %v223_v1 = vand.u32 2147483647, %v221_v0  ;;  %vm236_vm0 = vcmp.ge.f32.partialorder %v221_v0, 0.0  ;;  %v240_v9 = vsub.f32 1.0, %v222_v6  ;;  %v230_v16 = vmax.f32 %v221_v0, 0.0  ;;  %s281_s18 = sshll.u32 %s213_s21, 4  ;;  %s279_s29 = scalar_lea.hbm %s803_s2, %s397_s19  ;;  %s282_s18 = int_to_ptr.vmem [resolvable:$true] %s281_s18 }
  0x3b   : > { %v231_v17 = vmul.f32 %v222_v6, %v221_v0  ;;  %v244_v21 = vmul.f32 0.25, %v222_v6  ;;  %s268_s3 = scalar_lea.sflag [#allocation5], %s743_s25  ;;  %s531_s7 = scalar_lea.vmem %s282_s18, 128 }
  0x3c   : > { %v224_v2 = vsub.f32 0.0, %v223_v1  ;;  %v245_v22 = vmul.f32 0.75, %v240_v9  ;;  %p532_p8 = scmp.ne.s32.totalorder %s282_s18, %s531_s7  ;;  %s619_s8 = smov [#allocation8]  }
  0x3d   : > { %v232_v20 = vsub.f32 %v230_v16, %v231_v17  ;;  %s535_s30 = sshll.u32 %s619_s8, 4  ;;  %s536_s30 = int_to_ptr.vmem [resolvable:$false] %s535_s30 }
  0x3e   : > { %v225_v3 = vmul.f32 1.442695, %v224_v2  ;;  %v246_v24 = vadd.f32 %v245_v22, %v244_v21  ;;  %p533_p0 = pnand %p532_p8, %p686_p9  ;;  %s537_s4 = scalar_lea.vmem %s536_s30, 256 }
  0x3f   : > { %p538_p13 = scmp.lt.s32.totalorder %s282_s18, %s536_s30  ;;  %p539_p5 = scmp.lt.s32.totalorder %s537_s4, %s531_s7 }
  0x40   : > { %467 = vpow2.f32 %v225_v3  ;;  %p534_p3 = pneg %p533_p0 }
  0x41   : > { %p540_p12 = por %p539_p5, %p538_p13 }
  0x43   : > { %p541_p6 = pnand %p540_p12, %p534_p3 }
  0x4d   : > { %v468_v4 = vpop.eup %467 }
  0x4e   : > { %v227_v5 = vadd.f32 1.0, %v468_v4 }
  0x50   : > { %469 = vrcp.f32 %v227_v5 }
  0x51   : > { %471 = vlog2.f32 %v227_v5 }
  0x5d   : > { %v470_v7 = vpop.eup %469 }
  0x5e   : > { %v237_v8 = vmul.f32 %v470_v7, %v468_v4  ;;  %v472_v18 = vpop.eup %471 }
  0x5f   : > { %v229_v19 = vmul.f32 0.6931472, %v472_v18 }
  0x60   : > { %v238_v10 = vsel %vm236_vm0, %v470_v7, %v237_v8 }
  0x61   : > { %v239_v11 = vmul.f32 %v238_v10, %v222_v6  ;;  %v241_v12 = vsub.f32 1.0, %v238_v10  ;;  %v233_v23 = vadd.f32 %v232_v20, %v229_v19 }
  0x63   : > { %v242_v13 = vmul.f32 %v241_v12, %v240_v9  ;;  %v256_v29 = vmul.f32 %v246_v24, %v233_v23 }
  0x65   : > { %v243_v14 = vadd.f32 %v242_v13, %v239_v11 }
  0x67   : > { %v247_v15 = vsub.f32 1.0, %v243_v14 }
  0x69   : > { %473 = vrsqrt.f32 %v247_v15  ;;  %vm250_vm1 = vcmp.eq.f32.partialorder %v247_v15, inf  ;;  %v253_v26 = vand.u32 2147483648, %v247_v15  ;;  %vm252_vm2 = vcmp.eq.f32.partialorder %v247_v15, 0.0 }
  0x76   : > { %v474_v25 = vpop.eup %473 }
  0x77   : > { %v249_v27 = vmul.f32 %v474_v25, %v247_v15 }
  0x79   : > { %v251_v28 = vsel %vm250_vm1, %v247_v15, %v249_v27 }
  0x7a   : > { %v254_v30 = vsel %vm252_vm2, %v253_v26, %v251_v28 }
  0x7b   : > { %v255_v31 = vmul.f32 %v254_v30, %v247_v15 }
  0x7d   : > { %v257_v32 = vmul.f32 %v256_v29, %v255_v31 }
  0x7f   : > { %266 = vst [vmem:[%s213_s21] sm:$0xff] %v257_v32 }
  0x80   : > { %544 = shalt.err (!%p541_p6)
}
  0x81   : > { %s545_s12 = scalar_lea.hbm %s279_s29, 128  ;;  %s549_s26 = scalar_lea.hbm %s803_s2, 256 }
  0x82   : > { %p546_p7 = scmp.ne.s32.totalorder %s279_s29, %s545_s12  ;;  %p550_p4 = scmp.lt.s32.totalorder %s279_s29, %s803_s2 }
  0x83   : > { %p551_p10 = scmp.lt.s32.totalorder %s549_s26, %s545_s12 }
  0x84   : > { %p547_p1 = pnand %p546_p7, %p686_p9 }
  0x85   : > { %p552_p8 = por %p551_p10, %p550_p4 }
  0x86   : > { %p548_p2 = pneg %p547_p1 }
  0x88   : > { %p553_p0 = pnand %p552_p8, %p548_p2 }
  0x8a   : > { %556 = shalt.err (!%p553_p0)
}
  0x8b   : > { %404 = dma.vmem_to_hbm [thread:$0]  (%p686_p9), %s282_s18, 128, %s279_s29, %s268_s3  }
  0x8c PF: > { %s293_s5 = sand.u32 1, %s595_s9   ;;  %p810_p3 = scmp.ge.s32.totalorder %s615_s14, 2 }
  0x8d   : > { %s294_s16 = scalar_lea.sflag [#allocation5], %s293_s5 }
  0x8e   : > { %p414_p13 = pnand %p810_p3, %p693_p11 }
  0x90   : > { %p415_p5 = pneg %p414_p13 }
  0x92   : > { %590 = dma.done.wait (%p415_p5), %s294_s16, 128  }
  0x93   : > { %592 = vsyncadd (%p415_p5), %s294_s16, 4294967168  ;;  %s21_s14 = sadd.s32 1, %s615_s14   ;;  %s811_s9 = smov %s599_s10 }
  0x94   : > { %p18_p12 = scmp.ge.s32.totalorder %s21_s14, 4   ;;  %s812_s10 = smov %s603_s11 }
  0x95   : > { %s813_s11 = smov %s691_s23  ;;  %s814_s12 = smov %s611_s13 }
  0x96   : > { %s815_s13 = smov %s817_s17  ;;  %20 = sbr.rel (!%p18_p12) target bundleno = 8 (0x8), region = 94 }
  0x9b   :  { %299 = vsyncpa [#allocation4], 1 }
  0x9c   :  { %301 = vsyncpa [#allocation4 + $0x1], 1 }
  0x9d   :  { %302 = vsyncpa [#allocation7], 1 }
  0x9e   :  { %304 = vsyncpa [#allocation7 + $0x1], 1 }
  0x9f   :  { %305 = vsyncpa [#allocation5], 1 }
  0xa0   :  { %307 = vsyncpa [#allocation5 + $0x1], 1 }

</bundles_post_ra>
